<compile_context>
chip_gen: v5e
topology: v5e:2x2
jax: 0.10.0
libtpu: 0.0.40
codegen_flags: <defaults>
</compile_context>

<pallas_src>
import functools

import jax
import jax.numpy as jnp
from jax.experimental import pallas as pl
from jax.experimental.pallas import tpu as pltpu


def _round_up(a, b):
    return ((a + b - 1) // b) * b


def cgcam_kernel(x_ref, wdw_ref, bdw_ref, wc_ref, bc_ref, o_ref, acc_ref, *, inv_hw):
    # x_ref:   (bt, C, lane_tile)  activation tile (input dtype, f32 or bf16)
    # wdw_ref: (1, C//2)           depthwise 1x1 conv weight (per-channel scale)
    # bdw_ref: (1, C//2)           depthwise 1x1 conv bias
    # wc_ref:  (C, out_dim)        final 1x1 conv weight (as matmul RHS)
    # bc_ref:  (1, out_dim)        final 1x1 conv bias
    # o_ref:   (bt, out_dim)       output tile (resident across the hw axis)
    # acc_ref: (bt, C) f32 scratch running spatial sum
    hw_step = pl.program_id(1)

    @pl.when(hw_step == 0)
    def _():
        acc_ref[...] = jnp.zeros_like(acc_ref)

    # Partial spatial sum for this tile; accumulate in f32 (bf16-input safe).
    x = x_ref[...].astype(jnp.float32)               # (bt, C, lane_tile)
    acc_ref[...] += jnp.sum(x, axis=-1)              # (bt, C)

    @pl.when(hw_step == pl.num_programs(1) - 1)
    def _():
        pooled = acc_ref[...] * inv_hw               # GAP -> (bt, C); true H*W
        half = wdw_ref.shape[1]
        w = wdw_ref[...]                             # (1, half) broadcasts over rows
        b = bdw_ref[...]

        x1 = pooled[:, :half]                        # torch.split(x, C//2, dim=1)
        x2 = pooled[:, half:]
        x1 = x1 * w + b                              # conv1x1(x1)  (depthwise)
        x2 = x2 * w + b                              # conv1x1(x2)
        x1 = x1 + x2
        x1 = x1 * w + b                              # conv1x1(x1)
        x2 = x1 + x2
        x2 = x2 * w + b                              # conv1x1(x2)

        g1 = jax.nn.sigmoid(x1)
        g2 = jax.nn.sigmoid(x2)

        # cat([g1, g2], dim=1) followed by a 1x1 conv C -> out_dim, done as two
        # matmuls against the split weight (avoids a lane concat).  Runs once
        # per output tile, only on the last spatial step.
        wc = wc_ref[...]                             # (C, out_dim)
        out = (jnp.dot(g1, wc[:half, :], preferred_element_type=jnp.float32)
               + jnp.dot(g2, wc[half:, :], preferred_element_type=jnp.float32)
               + bc_ref[...])
        o_ref[...] = out.astype(o_ref.dtype)


def cgcam_forward(x, w_dw, b_dw, w_conv, b_conv, *, lane_tile=None, batch_tile=None):
    """x: NCHW (B, C, H, W), f32 or bf16. Returns (B, out_dim, 1, 1) float32."""
    B, C, H, W = x.shape
    assert C % 2 == 0, "CGCAM requires an even channel count (torch.split semantics)"
    out_dim = w_conv.shape[0]
    half = C // 2
    HW = H * W
    itemsize = jnp.dtype(x.dtype).itemsize

    # --- tile sizing ---------------------------------------------------------
    bt = batch_tile if batch_tile is not None else min(B, 8)
    if lane_tile is None:
        budget = 8 * 1024 * 1024                      # <= ~8 MiB per x buffer
        max_lanes = max(128, (budget // max(1, bt * C * itemsize)) // 128 * 128)
        lane_tile = int(min(2048, max_lanes, _round_up(HW, 128)))
    assert lane_tile % 128 == 0 and lane_tile >= 128

    HW_pad = _round_up(HW, lane_tile)
    B_pad = _round_up(B, bt)

    # --- layout --------------------------------------------------------------
    x_flat = x.reshape(B, C, HW)                      # keep input dtype (bf16 ok)
    if HW_pad != HW or B_pad != B:
        x_flat = jnp.pad(x_flat, ((0, B_pad - B), (0, 0), (0, HW_pad - HW)))

    wdw = w_dw.reshape(1, half).astype(jnp.float32)   # depthwise (C/2,1,1,1) -> (1, C/2)
    bdw = b_dw.reshape(1, half).astype(jnp.float32)
    wc = w_conv.reshape(out_dim, C).T.astype(jnp.float32)   # (C, out_dim)
    bc = b_conv.reshape(1, out_dim).astype(jnp.float32)

    grid = (B_pad // bt, HW_pad // lane_tile)

    x_block_bytes = bt * C * lane_tile * itemsize
    vmem_limit = int(min(64 << 20, max(16 << 20, 4 * x_block_bytes + (2 << 20))))

    kernel = functools.partial(cgcam_kernel, inv_hw=1.0 / float(HW))

    out = pl.pallas_call(
        kernel,
        out_shape=jax.ShapeDtypeStruct((B_pad, out_dim), jnp.float32),
        grid_spec=pltpu.PrefetchScalarGridSpec(
            num_scalar_prefetch=0,
            grid=grid,
            in_specs=[
                # activations: pipelined over (batch tile, spatial tile)
                pl.BlockSpec((bt, C, lane_tile), lambda bi, hi: (bi, 0, hi)),
                # parameters: constant block index -> DMA'd once, stay resident
                pl.BlockSpec((1, half), lambda bi, hi: (0, 0)),
                pl.BlockSpec((1, half), lambda bi, hi: (0, 0)),
                pl.BlockSpec((C, out_dim), lambda bi, hi: (0, 0)),
                pl.BlockSpec((1, out_dim), lambda bi, hi: (0, 0)),
            ],
            out_specs=pl.BlockSpec((bt, out_dim), lambda bi, hi: (bi, 0)),
            scratch_shapes=[pltpu.VMEM((bt, C), jnp.float32)],
        ),
        compiler_params=pltpu.CompilerParams(
            dimension_semantics=("parallel", "arbitrary"),
            vmem_limit_bytes=vmem_limit,
        ),
    )(x_flat, wdw, bdw, wc, bc)

    return out[:B].reshape(B, out_dim, 1, 1)


def cgcam_reference(x, w_dw, b_dw, w_conv, b_conv):
    """Pure-JAX reference mirroring the PyTorch forward, for verification."""
    B, C, H, W = x.shape
    half = C // 2
    out_dim = w_conv.shape[0]
    pooled = jnp.mean(x.astype(jnp.float32), axis=(2, 3))          # (B, C)
    w = w_dw.reshape(1, half)
    b = b_dw.reshape(1, half)
    x1 = pooled[:, :half]
    x2 = pooled[:, half:]
    x1 = x1 * w + b
    x2 = x2 * w + b
    x1 = x1 + x2
    x1 = x1 * w + b
    x2 = x1 + x2
    x2 = x2 * w + b
    cat = jnp.concatenate([jax.nn.sigmoid(x1), jax.nn.sigmoid(x2)], axis=1)
    out = cat @ w_conv.reshape(out_dim, C).T + b_conv.reshape(1, out_dim)
    return out.reshape(B, out_dim, 1, 1)


if __name__ == "__main__":
    key = jax.random.PRNGKey(0)
    kx, k1, k2, k3, k4, kx2 = jax.random.split(key, 6)

    # Case 1: module-sized toy shapes, f32, auto tile sizing.
    in_dim, out_dim = 4, 8
    B, H, W = 2, 16, 16
    x = jax.random.normal(kx, (B, in_dim, H, W), dtype=jnp.float32)
    # conv1x1: Conv2d(C/2, C/2, 1, groups=C/2) -> weight (C/2, 1, 1, 1), bias (C/2,)
    w_dw = jax.random.normal(k1, (in_dim // 2, 1, 1, 1), dtype=jnp.float32) * 0.5
    b_dw = jax.random.normal(k2, (in_dim // 2,), dtype=jnp.float32) * 0.1
    # conv: Conv2d(C, out_dim, 1) -> weight (out_dim, C, 1, 1), bias (out_dim,)
    w_conv = jax.random.normal(k3, (out_dim, in_dim, 1, 1), dtype=jnp.float32) * 0.5
    b_conv = jax.random.normal(k4, (out_dim,), dtype=jnp.float32) * 0.1

    ref = cgcam_reference(x, w_dw, b_dw, w_conv, b_conv)

    out = jax.block_until_ready(cgcam_forward(x, w_dw, b_dw, w_conv, b_conv))
    assert out.shape == (B, out_dim, 1, 1)
    assert jnp.allclose(out, ref, atol=1e-5, rtol=1e-5), "mismatch vs reference (auto tile)"

    # Case 2: force a multi-step spatial reduction (2 hw tiles) to exercise the
    # accumulator init / accumulate / finalize path.
    out2 = jax.block_until_ready(
        cgcam_forward(x, w_dw, b_dw, w_conv, b_conv, lane_tile=128))
    assert jnp.allclose(out2, ref, atol=1e-5, rtol=1e-5), "mismatch vs reference (tiled hw)"

    # Case 3: bf16 activations (half the HBM bytes); GAP still accumulates in f32.
    x_bf16 = x.astype(jnp.bfloat16)
    ref_bf16 = cgcam_reference(x_bf16.astype(jnp.float32), w_dw, b_dw, w_conv, b_conv)
    out3 = jax.block_until_ready(
        cgcam_forward(x_bf16, w_dw, b_dw, w_conv, b_conv, lane_tile=128))
    assert jnp.allclose(out3, ref_bf16, atol=1e-3, rtol=1e-3), "mismatch vs reference (bf16)"

    # Case 4: odd sizes requiring spatial zero-padding (HW=100 -> 128).
    B4, C4, H4, W4, OD4 = 3, 6, 10, 10, 5
    x4 = jax.random.normal(kx2, (B4, C4, H4, W4), dtype=jnp.float32)
    kk = jax.random.split(k4, 4)
    w_dw4 = jax.random.normal(kk[0], (C4 // 2, 1, 1, 1), dtype=jnp.float32) * 0.5
    b_dw4 = jax.random.normal(kk[1], (C4 // 2,), dtype=jnp.float32) * 0.1
    w_conv4 = jax.random.normal(kk[2], (OD4, C4, 1, 1), dtype=jnp.float32) * 0.5
    b_conv4 = jax.random.normal(kk[3], (OD4,), dtype=jnp.float32) * 0.1
    ref4 = cgcam_reference(x4, w_dw4, b_dw4, w_conv4, b_conv4)
    out4 = jax.block_until_ready(cgcam_forward(x4, w_dw4, b_dw4, w_conv4, b_conv4))
    assert jnp.allclose(out4, ref4, atol=1e-5, rtol=1e-5), "mismatch vs reference (padded)"

    print("KERNEL_OK")
</pallas_src>

<mosaic_0001>
module attributes {stable_mosaic.version = 11 : i64} {
  func.func @cgcam_kernel(%arg0: i32, %arg1: i32, %arg2: memref<2x4x256xf32, #tpu.memory_space<vmem>>, %arg3: memref<1x2xf32, #tpu.memory_space<vmem>>, %arg4: memref<1x2xf32, #tpu.memory_space<vmem>>, %arg5: memref<4x8xf32, #tpu.memory_space<vmem>>, %arg6: memref<1x8xf32, #tpu.memory_space<vmem>>, %arg7: memref<2x8xf32, #tpu.memory_space<vmem>>, %arg8: memref<2x4xf32, #tpu.memory_space<vmem>>) attributes {dimension_semantics = [#tpu.dimension_semantics<parallel>, #tpu.dimension_semantics<arbitrary>], iteration_bounds = array<i64: 1, 1>, scalar_prefetch = 0 : i64, scratch_operands = 1 : i64, tpu.core_type = #tpu.core_type<tc>, window_params = [{transform_indices = @transform_0, window_bounds = array<i64: 2, 4, 256>}, {pipeline_mode = #tpu.pipeline_mode<synchronous>, transform_indices = @transform_1, window_bounds = array<i64: 1, 2>}, {pipeline_mode = #tpu.pipeline_mode<synchronous>, transform_indices = @transform_2, window_bounds = array<i64: 1, 2>}, {pipeline_mode = #tpu.pipeline_mode<synchronous>, transform_indices = @transform_3, window_bounds = array<i64: 4, 8>}, {pipeline_mode = #tpu.pipeline_mode<synchronous>, transform_indices = @transform_4, window_bounds = array<i64: 1, 8>}, {transform_indices = @transform_5, window_bounds = array<i64: 2, 8>}]} {
    %c0_i32 = arith.constant 0 : i32
    %0 = arith.cmpi eq, %arg1, %c0_i32 : i32
    %1 = arith.extui %0 : i1 to i32
    %c0_i32_0 = arith.constant 0 : i32
    %2 = arith.cmpi ne, %1, %c0_i32_0 : i32
    scf.if %2 {
      %cst_9 = arith.constant 0.000000e+00 : f32
      %11 = vector.broadcast %cst_9 : f32 to vector<2x4xf32>
      %c0_10 = arith.constant 0 : index
      %c0_11 = arith.constant 0 : index
      %12 = vector.load %arg8[%c0_10, %c0_11] : memref<2x4xf32, #tpu.memory_space<vmem>>, vector<2x4xf32>
      tpu.vector_store %arg8[%c0_10, %c0_11], %11 {strides = array<i32>} : memref<2x4xf32, #tpu.memory_space<vmem>>, vector<2x4xf32>,
    } else {
    }
    %c0 = arith.constant 0 : index
    %c0_1 = arith.constant 0 : index
    %c0_2 = arith.constant 0 : index
    %3 = vector.load %arg2[%c0, %c0_1, %c0_2] : memref<2x4x256xf32, #tpu.memory_space<vmem>>, vector<2x4x256xf32>
    %c0_3 = arith.constant 0 : index
    %c0_4 = arith.constant 0 : index
    %4 = vector.load %arg8[%c0_3, %c0_4] : memref<2x4xf32, #tpu.memory_space<vmem>>, vector<2x4xf32>
    %cst = arith.constant dense<0.000000e+00> : vector<2x4xf32>
    %5 = vector.multi_reduction <add>, %3, %cst [2] : vector<2x4x256xf32> to vector<2x4xf32>
    %6 = arith.addf %4, %5 : vector<2x4xf32>
    %c0_5 = arith.constant 0 : index
    %c0_6 = arith.constant 0 : index
    %7 = vector.load %arg8[%c0_5, %c0_6] : memref<2x4xf32, #tpu.memory_space<vmem>>, vector<2x4xf32>
    tpu.vector_store %arg8[%c0_5, %c0_6], %6 {strides = array<i32>} : memref<2x4xf32, #tpu.memory_space<vmem>>, vector<2x4xf32>,
    %c0_i32_7 = arith.constant 0 : i32
    %8 = arith.cmpi eq, %arg1, %c0_i32_7 : i32
    %9 = arith.extui %8 : i1 to i32
    %c0_i32_8 = arith.constant 0 : i32
    %10 = arith.cmpi ne, %9, %c0_i32_8 : i32
    scf.if %10 {
      %c0_9 = arith.constant 0 : index
      %c0_10 = arith.constant 0 : index
      %11 = vector.load %arg8[%c0_9, %c0_10] : memref<2x4xf32, #tpu.memory_space<vmem>>, vector<2x4xf32>
      %cst_11 = arith.constant 3.906250e-03 : f32
      %12 = vector.broadcast %cst_11 : f32 to vector<2x4xf32>
      %13 = arith.mulf %11, %12 : vector<2x4xf32>
      %c0_12 = arith.constant 0 : index
      %c0_13 = arith.constant 0 : index
      %14 = vector.load %arg3[%c0_12, %c0_13] : memref<1x2xf32, #tpu.memory_space<vmem>>, vector<1x2xf32>
      %c0_14 = arith.constant 0 : index
      %c0_15 = arith.constant 0 : index
      %15 = vector.load %arg4[%c0_14, %c0_15] : memref<1x2xf32, #tpu.memory_space<vmem>>, vector<1x2xf32>
      %16 = vector.extract_strided_slice %13 {offsets = [0, 0], sizes = [2, 2], strides = [1, 1]} : vector<2x4xf32> to vector<2x2xf32>
      %17 = vector.extract_strided_slice %13 {offsets = [0, 2], sizes = [2, 2], strides = [1, 1]} : vector<2x4xf32> to vector<2x2xf32>
      %18 = vector.broadcast %14 : vector<1x2xf32> to vector<2x2xf32>
      %19 = arith.mulf %16, %18 : vector<2x2xf32>
      %20 = vector.broadcast %15 : vector<1x2xf32> to vector<2x2xf32>
      %21 = arith.addf %19, %20 : vector<2x2xf32>
      %22 = vector.broadcast %14 : vector<1x2xf32> to vector<2x2xf32>
      %23 = arith.mulf %17, %22 : vector<2x2xf32>
      %24 = vector.broadcast %15 : vector<1x2xf32> to vector<2x2xf32>
      %25 = arith.addf %23, %24 : vector<2x2xf32>
      %26 = arith.addf %21, %25 : vector<2x2xf32>
      %27 = vector.broadcast %14 : vector<1x2xf32> to vector<2x2xf32>
      %28 = arith.mulf %26, %27 : vector<2x2xf32>
      %29 = vector.broadcast %15 : vector<1x2xf32> to vector<2x2xf32>
      %30 = arith.addf %28, %29 : vector<2x2xf32>
      %31 = arith.addf %30, %25 : vector<2x2xf32>
      %32 = vector.broadcast %14 : vector<1x2xf32> to vector<2x2xf32>
      %33 = arith.mulf %31, %32 : vector<2x2xf32>
      %34 = vector.broadcast %15 : vector<1x2xf32> to vector<2x2xf32>
      %35 = arith.addf %33, %34 : vector<2x2xf32>
      %36 = arith.negf %30 : vector<2x2xf32>
      %37 = math.exp %36 : vector<2x2xf32>
      %cst_16 = arith.constant 1.000000e+00 : f32
      %38 = vector.broadcast %cst_16 : f32 to vector<2x2xf32>
      %39 = arith.addf %38, %37 : vector<2x2xf32>
      %40 = arith.divf %38, %39 : vector<2x2xf32>
      %41 = arith.negf %35 : vector<2x2xf32>
      %42 = math.exp %41 : vector<2x2xf32>
      %cst_17 = arith.constant 1.000000e+00 : f32
      %43 = vector.broadcast %cst_17 : f32 to vector<2x2xf32>
      %44 = arith.addf %43, %42 : vector<2x2xf32>
      %45 = arith.divf %43, %44 : vector<2x2xf32>
      %c0_18 = arith.constant 0 : index
      %c0_19 = arith.constant 0 : index
      %46 = vector.load %arg5[%c0_18, %c0_19] : memref<4x8xf32, #tpu.memory_space<vmem>>, vector<4x8xf32>
      %47 = vector.extract_strided_slice %46 {offsets = [0, 0], sizes = [2, 8], strides = [1, 1]} : vector<4x8xf32> to vector<2x8xf32>
      %cst_20 = arith.constant dense<0.000000e+00> : vector<2x8xf32>
      %48 = tpu.matmul %40, %47, %cst_20 {dimension_numbers = #tpu.dot_dimension_numbers<[1], [0], [0], [1], [0, 0, 1, 1], [], []>} : vector<2x2xf32>, vector<2x8xf32>, vector<2x8xf32> -> vector<2x8xf32>
      %49 = vector.extract_strided_slice %46 {offsets = [2, 0], sizes = [2, 8], strides = [1, 1]} : vector<4x8xf32> to vector<2x8xf32>
      %cst_21 = arith.constant dense<0.000000e+00> : vector<2x8xf32>
      %50 = tpu.matmul %45, %49, %cst_21 {dimension_numbers = #tpu.dot_dimension_numbers<[1], [0], [0], [1], [0, 0, 1, 1], [], []>} : vector<2x2xf32>, vector<2x8xf32>, vector<2x8xf32> -> vector<2x8xf32>
      %51 = arith.addf %48, %50 : vector<2x8xf32>
      %c0_22 = arith.constant 0 : index
      %c0_23 = arith.constant 0 : index
      %52 = vector.load %arg6[%c0_22, %c0_23] : memref<1x8xf32, #tpu.memory_space<vmem>>, vector<1x8xf32>
      %53 = vector.broadcast %52 : vector<1x8xf32> to vector<2x8xf32>
      %54 = arith.addf %51, %53 : vector<2x8xf32>
      %c0_24 = arith.constant 0 : index
      %c0_25 = arith.constant 0 : index
      %55 = vector.load %arg7[%c0_24, %c0_25] : memref<2x8xf32, #tpu.memory_space<vmem>>, vector<2x8xf32>
      tpu.vector_store %arg7[%c0_24, %c0_25], %54 {strides = array<i32>} : memref<2x8xf32, #tpu.memory_space<vmem>>, vector<2x8xf32>,
    } else {
    }
    return
  }
  func.func @transform_0(%arg0: i32, %arg1: i32) -> (i32, i32, i32) {
    %c0_i32 = arith.constant 0 : i32
    %c0_i32_0 = arith.constant 0 : i32
    return %arg0, %c0_i32, %arg1 : i32, i32, i32
  }
  func.func @transform_1(%arg0: i32, %arg1: i32) -> (i32, i32) {
    %c0_i32 = arith.constant 0 : i32
    %c0_i32_0 = arith.constant 0 : i32
    %c0_i32_1 = arith.constant 0 : i32
    return %c0_i32, %c0_i32_0 : i32, i32
  }
  func.func @transform_2(%arg0: i32, %arg1: i32) -> (i32, i32) {
    %c0_i32 = arith.constant 0 : i32
    %c0_i32_0 = arith.constant 0 : i32
    %c0_i32_1 = arith.constant 0 : i32
    return %c0_i32, %c0_i32_0 : i32, i32
  }
  func.func @transform_3(%arg0: i32, %arg1: i32) -> (i32, i32) {
    %c0_i32 = arith.constant 0 : i32
    %c0_i32_0 = arith.constant 0 : i32
    %c0_i32_1 = arith.constant 0 : i32
    return %c0_i32, %c0_i32_0 : i32, i32
  }
  func.func @transform_4(%arg0: i32, %arg1: i32) -> (i32, i32) {
    %c0_i32 = arith.constant 0 : i32
    %c0_i32_0 = arith.constant 0 : i32
    %c0_i32_1 = arith.constant 0 : i32
    return %c0_i32, %c0_i32_0 : i32, i32
  }
  func.func @transform_5(%arg0: i32, %arg1: i32) -> (i32, i32) {
    %c0_i32 = arith.constant 0 : i32
    %c0_i32_0 = arith.constant 0 : i32
    return %arg0, %c0_i32 : i32, i32
  }
}

</mosaic_0001>

<bundles_post_ra>
// kernel: tpu_custom_call.1
= control target key start
LH: loop header
LB: loop body
LE: loop exit
PB: predicated region body
PF: predicated region fallthrough
CT: control target
= control target key end

     0   :  { %10 = vsyncpa [#allocation4], 0  ;;  %s447_s0 = inlined_call_operand.hbm [shape: f32[2,4,256], index: 0, kind: input, shape index: {}]   ;;  %s448_s1 = inlined_call_operand.hbm [shape: f32[1,2], index: 1, kind: input, shape index: {}]   ;;  %s449_s2 = inlined_call_operand.vmem [shape: f32[1,2], index: 2, kind: input, shape index: {}]   ;;  %s450_s3 = inlined_call_operand.hbm [shape: f32[4,8], index: 3, kind: input, shape index: {}]   ;;  %s451_s4 = inlined_call_operand.vmem [shape: f32[1,8], index: 4, kind: input, shape index: {}]   ;;  %s452_s5 = inlined_call_operand.hbm [shape: f32[2,8], index: 5, kind: output, shape index: {}]  }
   0x1   :  { %11 = vsyncpa [#allocation7], 0  ;;  %s31_s20 = sshll.u32 %s448_s1, 4  ;;  %s32_s20 = int_to_ptr.hbm [resolvable:$true] %s31_s20 }
   0x2   :  { %12 = vsyncpa [#allocation5], 0  ;;  %s388_s21 = smov [#allocation6]   ;;  %s17_s25 = sshll.u32 %s447_s0, 4  ;;  %s18_s25 = int_to_ptr.hbm [resolvable:$true] %s17_s25 }
   0x3   :  { %s33_s22 = sshll.u32 %s388_s21, 4  ;;  %s389_s26 = smov [#allocation3]   ;;  %s34_s22 = int_to_ptr.vmem [resolvable:$true] %s33_s22 }
   0x4   :  { %36 = dma.hbm_to_vmem [thread:$0]  %s32_s20, 16, %s34_s22, [#allocation7]  }
   0x5   :  { %s19_s27 = sshll.u32 %s389_s26, 4  ;;  %s390_s28 = smov 128   ;;  %s20_s27 = int_to_ptr.vmem [resolvable:$true] %s19_s27 }
   0x6   :  { %s391_s29 = smov 8   ;;  %s44_s1 = sshll.u32 %s450_s3, 4  ;;  %s45_s1 = int_to_ptr.hbm [resolvable:$true] %s44_s1 }
   0x7   :  { %25 = dma.hbm_to_vmem [thread:$0]  %s18_s25, 256, %s20_s27, [#allocation4], %s390_s28, %s390_s28, %s391_s29  }
   0x8   :  { %s392_s7 = smov [#allocation8]  }
   0x9   :  { %s46_s8 = sshll.u32 %s392_s7, 4  ;;  %s47_s8 = int_to_ptr.vmem [resolvable:$true] %s46_s8 }
   0xa   :  { %49 = dma.hbm_to_vmem [thread:$0]  %s45_s1, 64, %s47_s8, [#allocation7]  }
   0xb   :  { %382 = dma.done.wait [#allocation4], 256  }
   0xc   :  { %383 = vsyncadd [#allocation4], 4294967040 }
   0xd   :  { %384 = dma.done.wait [#allocation7], 80  }
   0xe   :  { %385 = vsyncadd [#allocation7], 4294967216  ;;  %v70_v0 = vld [vmem:[#allocation3] sm:$0xff]  ;;  %v71_v1 = vld [vmem:[#allocation3 + $0x8] sm:$0xff]  ;;  %s393_s0 = smov 2   ;;  %vm86_vm0 = vcmask 1043456   ;;  %v99_v16 = vlaneseq }
   0xf   :  { %75 = vst [vmem:[#allocation1] ss:$2 sm:$0xff] %v70_v0  ;;  %v275_v2 = vld [vmem:[#allocation6] ss:$0 sm:$0xff]  ;;  %v276_v3 = vld [vmem:[%s449_s2] ss:$0 sm:$0xff] }
  0x10   :  { %79 = vst [vmem:[#allocation1 + $0x10] ss:$2 sm:$0xff] %v71_v1  ;;  %124 = vrot.lane.b32.xlu1 %v275_v2, %s393_s0  ;;  %vm68_vm1 = vcmask 25600   ;;  %v394_v14 = vmov 0.0   ;;  %v100_v17 = vand.u32 127, %v99_v16  ;;  %vm103_vm2 = vcmask 1041409  }
  0x11   :  { %69 = vst.msk [vmem:[#allocation2] sm:$0x3] %vm68_vm1, %v394_v14  ;;  %s395_s2 = smov 126   ;;  %v180_v30 = vld [vmem:[#allocation8] sm:$0xf]  ;;  %vm187_vm3 = vcmask 1041408  }
  0x12   :  { %264 = vmatpush.msk.msra.mxu1 %vm187_vm3, %v180_v30  ;;  %v182_v36 = vrot.slane %v180_v30, 2  ;;  %vm183_vm7 = vcmask 15360   ;;  %s396_s12 = smov [#allocation9]   ;;  %s249_s16 = sshll.u32 %s452_s5, 4  ;;  %vm240_vm13 = vcmask 58368   ;;  %s250_s16 = int_to_ptr.hbm [resolvable:$true] %s249_s16 }
  0x13   :  { %s247_s13 = sshll.u32 %s396_s12, 4  ;;  %s248_s13 = int_to_ptr.vmem [resolvable:$true] %s247_s13 }
  0x14   :  { %262 = vmatpush.msk.msra.mxu0 %vm187_vm3, %v182_v36 }
  0x16   :  { %v76_v4 = vld.sshfl [vmem:[#allocation1] sm:$0xff pattern:$0x75316420]  ;;  %v77_v5 = vld.sshfl [vmem:[#allocation1 + $0x8] sm:$0xff pattern:$0x75316420] }
  0x17   :  { %v87_v6 = vsel %vm86_vm0, %v76_v4, 0.0  ;;  %v88_v7 = vsel %vm86_vm0, %v77_v5, 0.0  ;;  %v80_v9 = vld.sshfl [vmem:[#allocation1 + $0x10] sm:$0xff pattern:$0x75316420] }
  0x18   :  { %v89_v8 = vadd.f32 %v88_v7, %v87_v6  ;;  %v81_v10 = vld.sshfl [vmem:[#allocation1 + $0x18] sm:$0xff pattern:$0x75316420]  ;;  %128 = vrot.lane.b32.xlu1 %v276_v3, %s393_s0  ;;  %v92_v11 = vsel %vm86_vm0, %v80_v9, 0.0  ;;  %v72_v20 = vld [vmem:[#allocation2] sm:$0x3] }
  0x19   :  { %v93_v12 = vsel %vm86_vm0, %v81_v10, 0.0 }
  0x1a   :  { %90 = vadd.xlane.f32.xlu0 %v89_v8  ;;  %v94_v13 = vadd.f32 %v93_v12, %v92_v11 }
  0x22   :  { %95 = vadd.xlane.f32.xlu0 %v94_v13 }
  0x82   :  { %v125_v24 = vpop.permute.xlu1 %124 }
  0x8a   :  { %v129_v27 = vpop.permute.xlu1 %128 }
  0x8d   :  { %v91_v15 = vpop.xlane.xlu0 %90 }
  0x8e   :  { %v101_v19 = vperm.slane %v91_v15, %v100_v17 }
  0x95   :  { %v96_v18 = vpop.xlane.xlu0 %95 }
  0x96   :  { %v102_v21 = vperm.slane %v96_v18, %v100_v17 }
  0x98   :  { %v104_v22 = vsel %vm103_vm2, %v102_v21, %v101_v19 }
  0x99   :  { %v106_v23 = vadd.f32 %v104_v22, %v72_v20 }
  0x9b   :  { %108 = vst.msk [vmem:[#allocation2] sm:$0x3] %vm68_vm1, %v106_v23 }
  0xa2   :  { %v112_v25 = vld [vmem:[#allocation2] sm:$0x3] }
  0xa3   :  { %v113_v26 = vmul.f32 0.00390625, %v112_v25 }
  0xa5   :  { %v127_v28 = vmul.f32 %v125_v24, %v113_v26  ;;  %v119_v31 = vmul.f32 %v275_v2, %v113_v26 }
  0xa7   :  { %v131_v29 = vadd.f32 %v129_v27, %v127_v28  ;;  %v123_v32 = vadd.f32 %v276_v3, %v119_v31 }
  0xa9   :  { %133 = vrot.lane.b32.xlu2 %v131_v29, %s395_s2 }
 0x103   :  { %v134_v33 = vpop.permute.xlu2 %133 }
 0x104   :  { %v136_v34 = vadd.f32 %v134_v33, %v123_v32 }
 0x106   :  { %v137_v35 = vmul.f32 %v275_v2, %v136_v34 }
 0x108   :  { %v138_v37 = vadd.f32 %v276_v3, %v137_v35 }
 0x10a   :  { %v139_v38 = vadd.f32 %v138_v37, %v134_v33  ;;  %v260_v39 = vmul.f32 -1.442695, %v138_v37 }
 0x10c   :  { %v140_v40 = vmul.f32 %v275_v2, %v139_v38  ;;  %278 = vpow2.f32 %v260_v39 }
 0x10e   :  { %v141_v41 = vadd.f32 %v276_v3, %v140_v40  ;;  %v277_v3 = vld [vmem:[%s451_s4] ss:$0 sm:$0xff] }
 0x110   :  { %v261_v42 = vmul.f32 -1.442695, %v141_v41 }
 0x112   :  { %v279_v43 = vpop.eup %278  ;;  %280 = vpow2.f32 %v261_v42 }
 0x113   :  { %v145_v44 = vadd.f32 1.0, %v279_v43 }
 0x115   :  { %282 = vrcp.f32 %v145_v44  ;;  %v157_v50 = vand.u32 2147483648, %v145_v44  ;;  %v155_v52 = vand.u32 2147483647, %v145_v44  ;;  %vm151_vm5 = vweird.f32 %v145_v44 }
 0x117   :  { %v158_v56 = vor.u32 1.1754944e-38, %v157_v50  ;;  %vm156_vm8 = vcmp.eq.f32.partialorder %v155_v52, 8.507059e+37 }
 0x118   :  { %v281_v45 = vpop.eup %280 }
 0x119   :  { %v164_v46 = vadd.f32 1.0, %v281_v45 }
 0x11b   :  { %v283_v47 = vpop.eup %282  ;;  %284 = vrcp.f32 %v164_v46  ;;  %v176_v60 = vand.u32 2147483648, %v164_v46  ;;  %v174_v62 = vand.u32 2147483647, %v164_v46  ;;  %vm170_vm10 = vweird.f32 %v164_v46 }
 0x11c   :  { %v147_v48 = vmul.f32 %v283_v47, %v145_v44  ;;  %vm152_vm4 = vweird.f32 %v283_v47 }
 0x11d   :  { %vm153_vm6 = vmor %vm151_vm5, %vm152_vm4  ;;  %v177_v0 = vor.u32 1.1754944e-38, %v176_v60  ;;  %vm175_vm12 = vcmp.eq.f32.partialorder %v174_v62, 8.507059e+37 }
 0x11e   :  { %v148_v49 = vsub.f32 1.0, %v147_v48 }
 0x120   :  { %v149_v51 = vmul.f32 %v283_v47, %v148_v49 }
 0x121   :  { %v285_v53 = vpop.eup %284 }
 0x122   :  { %v150_v54 = vadd.f32 %v283_v47, %v149_v51  ;;  %v166_v55 = vmul.f32 %v285_v53, %v164_v46  ;;  %vm171_vm9 = vweird.f32 %v285_v53 }
 0x123   :  { %vm172_vm11 = vmor %vm170_vm10, %vm171_vm9 }
 0x124   :  { %v154_v57 = vsel %vm153_vm6, %v283_v47, %v150_v54  ;;  %v167_v58 = vsub.f32 1.0, %v166_v55 }
 0x125   :  { %v159_v59 = vsel %vm156_vm8, %v158_v56, %v154_v57 }
 0x126   :  { %265 = vmatmul.msk.f32.vlgmr.msra.gmra.mxu1 %vm183_vm7, %v159_v59  ;;  %v168_v61 = vmul.f32 %v285_v53, %v167_v58 }
 0x128   :  { %v169_v63 = vadd.f32 %v285_v53, %v168_v61 }
 0x12a   :  { %v173_v1 = vsel %vm172_vm11, %v285_v53, %v169_v63 }
 0x12b   :  { %v178_v2 = vsel %vm175_vm12, %v177_v0, %v173_v1 }
 0x12c   :  { %263 = vmatmul.msk.f32.vlgmr.msra.gmra.mxu0 %vm183_vm7, %v178_v2 }
 0x1a3   :  { %v232_v4 = vpop.f32.mrf.mxu1 }
 0x1a9   :  { %v207_v5 = vpop.f32.mrf.mxu0 }
 0x1aa   :  { %v233_v6 = vadd.f32 %v232_v4, %v207_v5 }
 0x1ac   :  { %v239_v7 = vadd.f32 %v277_v3, %v233_v6 }
 0x1ae   :  { %241 = vst.msk [vmem:[#allocation9] sm:$0x3] %vm240_vm13, %v239_v7 }
 0x1af   :  { %252 = dma.vmem_to_hbm [thread:$0]  %s248_s13, 32, %s250_s16, [#allocation5]  }
 0x1b0   :  { %386 = dma.done.wait [#allocation5], 32  }
 0x1b1   :  { %387 = vsyncadd [#allocation5], 4294967264 }
 0x1b2   :  { %257 = vsyncpa [#allocation4], 1 }
 0x1b3   :  { %258 = vsyncpa [#allocation7], 1 }
 0x1b4   :  { %259 = vsyncpa [#allocation5], 1 }

</bundles_post_ra>
